<compile_context>
chip_gen: v6e
topology: v6e:2x2x1
jax: 0.10.0
libtpu: 0.0.40
codegen_flags: <defaults>
</compile_context>

<pallas_src>
import functools

import jax
import jax.numpy as jnp
from jax.experimental import pallas as pl
from jax.experimental.pallas import tpu as pltpu

LANES = 128
SUBLANES = 8
NUM_STATS = 5                       # sum_x, sum_y, sum_xx, sum_yy, sum_xy
DEFAULT_TILE_ROWS = 8192            # 8192 * 128 * 4 B = 4 MiB per f32 block
MAX_BLOCK_BYTES = 4 * 1024 * 1024   # per-input block cap (16 MiB double-buffered)


def _sublane_multiple(dtype) -> int:
    """Minimum sublane tile multiple for this dtype (8 f32, 16 bf16, 32 int8)."""
    return max(SUBLANES, 32 // jnp.dtype(dtype).itemsize)


def _dual_tensorcore() -> bool:
    """True on parts where a 'parallel' grid axis can shard across 2 TCs."""
    try:
        kind = jax.devices()[0].device_kind.lower()
    except Exception:  # pragma: no cover - defensive
        return False
    single_tc = ("v5e", "v5 lite", "v5lite", "v6e", "v6 lite", "v6lite")
    return not any(tag in kind for tag in single_tc)


def _pearson_stats_kernel(x_ref, y_ref, stats_ref, *, rows, tile_rows, ncols,
                          blocks_per_split, need_mask):
    """Accumulate five sufficient statistics as (8, ncols) vector partial sums.

    x_ref, y_ref : VMEM (tile_rows, ncols) tiles of the 2-D view of the inputs.
    stats_ref    : VMEM (5, 8, ncols) f32, resident accumulator for this split.
    """
    c = pl.program_id(0)   # TensorCore-split axis ("parallel")
    i = pl.program_id(1)   # running-reduction axis ("arbitrary")

    @pl.when(i == 0)
    def _init():
        stats_ref[...] = jnp.zeros_like(stats_ref)

    x = x_ref[...].astype(jnp.float32)
    y = y_ref[...].astype(jnp.float32)
    r = tile_rows // 8

    def accumulate(xv, yv):
        # VPU-only adds in the hot loop; the cross-lane (XLU) reduction and
        # the cov/var scalar math happen once, in the wrapper.
        x3 = xv.reshape(r, 8, ncols)
        y3 = yv.reshape(r, 8, ncols)
        stats_ref[0] += jnp.sum(x3, axis=0)
        stats_ref[1] += jnp.sum(y3, axis=0)
        stats_ref[2] += jnp.sum(x3 * x3, axis=0)
        stats_ref[3] += jnp.sum(y3 * y3, axis=0)
        stats_ref[4] += jnp.sum(x3 * y3, axis=0)

    if not need_mask:          # static: the grid covers `rows` exactly
        accumulate(x, y)
    else:
        row0 = (c * blocks_per_split + i) * tile_rows
        is_full = row0 + tile_rows <= rows

        @pl.when(is_full)
        def _fast_path():      # full blocks: zero masking overhead
            accumulate(x, y)

        @pl.when(jnp.logical_and(row0 < rows, jnp.logical_not(is_full)))
        def _boundary_path():  # at most one block per split
            local = jax.lax.broadcasted_iota(jnp.int32, (tile_rows, ncols), 0)
            valid = (row0 + local) < rows
            accumulate(jnp.where(valid, x, 0.0), jnp.where(valid, y, 0.0))
        # Phantom blocks from the ceil-split (row0 >= rows) match neither
        # branch: their clamped, re-read data is ignored entirely.


@functools.partial(jax.jit, static_argnames=("tile_rows", "force_splits"))
def pearson_correlation_loss(inp, tgt, *, tile_rows=DEFAULT_TILE_ROWS,
                             force_splits=None):
    assert inp.shape == tgt.shape, "input and target must have the same shape"
    n = inp.size
    itemsize = max(jnp.dtype(inp.dtype).itemsize, jnp.dtype(tgt.dtype).itemsize)
    sub = max(_sublane_multiple(inp.dtype), _sublane_multiple(tgt.dtype))

    # ---- choose a copy-free 2-D view (rows, ncols) of the flattened data ----
    if n % LANES == 0:
        ncols = LANES                       # lane-dense, optimal
    elif inp.ndim >= 2:
        ncols = inp.shape[-1]               # full last dim on lanes (no copy)
    else:
        ncols = n                           # 1-D ragged -> pure-JAX fallback
    rows = n // ncols if ncols > 0 else 0

    ncols_padded = -(-ncols // LANES) * LANES if ncols > 0 else 0
    rows_budget = (MAX_BLOCK_BYTES // (ncols_padded * itemsize)) if ncols_padded else 0
    tile_rows_eff = min(tile_rows, rows, rows_budget)
    tile_rows_eff = (tile_rows_eff // sub) * sub

    if tile_rows_eff <= 0 or rows <= 0:
        # Tiny or degenerate shapes: plain-JAX reference (always correct).
        x = inp.astype(jnp.float32)
        y = tgt.astype(jnp.float32)
        xc = x - jnp.mean(x)
        yc = y - jnp.mean(y)
        pr = jnp.sum(xc * yc) / (jnp.sqrt(jnp.sum(xc * xc)) *
                                 jnp.sqrt(jnp.sum(yc * yc)))
        return (jnp.float32(1.0) - pr).astype(jnp.float32)

    x2 = inp.reshape(rows, ncols)           # free reshape (contiguous)
    y2 = tgt.reshape(rows, ncols)

    num_blocks = -(-rows // tile_rows_eff)
    if force_splits is not None:
        num_splits = max(1, min(int(force_splits), num_blocks))
    else:
        num_splits = 2 if (num_blocks >= 2 and _dual_tensorcore()) else 1
    bps = -(-num_blocks // num_splits)       # blocks per split
    covered_rows = num_splits * bps * tile_rows_eff
    need_mask = covered_rows != rows
    last_block = num_blocks - 1

    def data_map(c, i):
        # Clamp so phantom (fully-out-of-range) iterations re-read a valid
        # block; they contribute nothing because the kernel gates on the
        # *unclamped* logical row index.
        return (jnp.minimum(c * bps + i, last_block), 0)

    kernel = functools.partial(
        _pearson_stats_kernel,
        rows=rows, tile_rows=tile_rows_eff, ncols=ncols,
        blocks_per_split=bps, need_mask=need_mask)

    stats_blocks = pl.pallas_call(
        kernel,
        out_shape=jax.ShapeDtypeStruct(
            (num_splits, NUM_STATS, SUBLANES, ncols), jnp.float32),
        grid_spec=pltpu.PrefetchScalarGridSpec(
            num_scalar_prefetch=0,
            grid=(num_splits, bps),
            in_specs=[
                pl.BlockSpec((tile_rows_eff, ncols), data_map),
                pl.BlockSpec((tile_rows_eff, ncols), data_map),
            ],
            out_specs=pl.BlockSpec((None, NUM_STATS, SUBLANES, ncols),
                                   lambda c, i: (c, 0, 0, 0)),
        ),
        compiler_params=pltpu.CompilerParams(
            dimension_semantics=("parallel", "arbitrary"),
            vmem_limit_bytes=32 * 1024 * 1024),
    )(x2, y2)

    # Single cross-lane reduction + finalize; fuses into one tiny XLA op.
    stats = jnp.sum(stats_blocks, axis=(0, 2, 3))
    sx, sy, sxx, syy, sxy = stats[0], stats[1], stats[2], stats[3], stats[4]
    inv_n = jnp.float32(1.0 / n)             # n is static -> exact on host
    cov = sxy - sx * sy * inv_n
    var_x = jnp.maximum(sxx - sx * sx * inv_n, 0.0)   # cancellation guard
    var_y = jnp.maximum(syy - sy * sy * inv_n, 0.0)
    pr = cov / (jnp.sqrt(var_x) * jnp.sqrt(var_y))
    return (jnp.float32(1.0) - pr).astype(jnp.float32)


def pearson_correlation_loss_ref(inp, tgt):
    """Pure-JAX reference mirroring the PyTorch module exactly."""
    x = inp - jnp.mean(inp)
    y = tgt - jnp.mean(tgt)
    x_norm = jnp.sqrt(jnp.sum(x * x))
    y_norm = jnp.sqrt(jnp.sum(y * y))
    return 1.0 - jnp.sum(x * y) / (x_norm * y_norm)


if __name__ == "__main__":
    key = jax.random.PRNGKey(0)
    k1, k2, k3, k4, k5, k6 = jax.random.split(key, 6)

    # 1) NCHW input as the PyTorch module would receive (aligned numel).
    shape = (2, 4, 16, 16)
    inp = jax.random.normal(k1, shape, dtype=jnp.float32)
    tgt = 0.7 * inp + 0.3 * jax.random.normal(k2, shape, dtype=jnp.float32)
    loss = jax.block_until_ready(pearson_correlation_loss(inp, tgt))
    ref = pearson_correlation_loss_ref(inp, tgt)
    assert jnp.allclose(loss, ref, atol=1e-4, rtol=1e-4), (loss, ref)

    # 2) Small tile + forced 2-way split: exercises the multi-block grid, the
    #    predicated boundary mask and phantom-block gating (75 rows, tile 16,
    #    2 splits -> 6 grid steps, 1 phantom, 1 masked boundary block).
    shape2 = (2, 3, 40, 40)
    inp2 = jax.random.normal(k3, shape2, dtype=jnp.float32)
    tgt2 = 0.5 * inp2 + 0.5 * jax.random.normal(k4, shape2, dtype=jnp.float32)
    loss2 = jax.block_until_ready(
        pearson_correlation_loss(inp2, tgt2, tile_rows=16, force_splits=2))
    ref2 = pearson_correlation_loss_ref(inp2, tgt2)
    assert jnp.allclose(loss2, ref2, atol=1e-4, rtol=1e-4), (loss2, ref2)

    # 3) numel % 128 != 0: copy-free (rows, last_dim) view path — no prefix
    #    slice copy, no plain-JAX tail reduction.
    shape3 = (3, 5, 26)
    inp3 = jax.random.normal(k5, shape3, dtype=jnp.float32)
    tgt3 = 0.2 * inp3 + 0.8 * jax.random.normal(k6, shape3, dtype=jnp.float32)
    loss3 = jax.block_until_ready(pearson_correlation_loss(inp3, tgt3))
    ref3 = pearson_correlation_loss_ref(inp3, tgt3)
    assert jnp.allclose(loss3, ref3, atol=1e-4, rtol=1e-4), (loss3, ref3)

    print("KERNEL_OK")
</pallas_src>

<mosaic_0001>
module attributes {stable_mosaic.version = 11 : i64} {
  func.func @_pearson_stats_kernel(%arg0: i32, %arg1: i32, %arg2: memref<16x128xf32, #tpu.memory_space<vmem>>, %arg3: memref<16x128xf32, #tpu.memory_space<vmem>>, %arg4: memref<1x5x8x128xf32, #tpu.memory_space<vmem>>) attributes {dimension_semantics = [#tpu.dimension_semantics<parallel>, #tpu.dimension_semantics<arbitrary>], iteration_bounds = array<i64: 1, 1>, scalar_prefetch = 0 : i64, scratch_operands = 0 : i64, tpu.core_type = #tpu.core_type<tc>, window_params = [{transform_indices = @transform_0, window_bounds = array<i64: 16, 128>}, {transform_indices = @transform_1, window_bounds = array<i64: 16, 128>}, {transform_indices = @transform_2, window_bounds = array<i64: 1, 5, 8, 128>}]} {
    %c0_i32 = arith.constant 0 : i32
    %0 = arith.cmpi eq, %arg1, %c0_i32 : i32
    %1 = arith.extui %0 : i1 to i32
    %c0_i32_0 = arith.constant 0 : i32
    %2 = arith.cmpi ne, %1, %c0_i32_0 : i32
    scf.if %2 {
      %cst_44 = arith.constant 0.000000e+00 : f32
      %45 = vector.broadcast %cst_44 : f32 to vector<5x8x128xf32>
      %c0_45 = arith.constant 0 : index
      %c0_46 = arith.constant 0 : index
      %c0_47 = arith.constant 0 : index
      %c0_48 = arith.constant 0 : index
      %46 = vector.load %arg4[%c0_45, %c0_46, %c0_47, %c0_48] : memref<1x5x8x128xf32, #tpu.memory_space<vmem>>, vector<1x5x8x128xf32>
      %47 = vector.shape_cast %46 : vector<1x5x8x128xf32> to vector<5x8x128xf32>
      %48 = vector.shape_cast %45 : vector<5x8x128xf32> to vector<1x5x8x128xf32>
      tpu.vector_store %arg4[%c0_45, %c0_46, %c0_47, %c0_48], %48 {strides = array<i32>} : memref<1x5x8x128xf32, #tpu.memory_space<vmem>>, vector<1x5x8x128xf32>,
    } else {
    }
    %c0 = arith.constant 0 : index
    %c0_1 = arith.constant 0 : index
    %3 = vector.load %arg2[%c0, %c0_1] : memref<16x128xf32, #tpu.memory_space<vmem>>, vector<16x128xf32>
    %c0_2 = arith.constant 0 : index
    %c0_3 = arith.constant 0 : index
    %4 = vector.load %arg3[%c0_2, %c0_3] : memref<16x128xf32, #tpu.memory_space<vmem>>, vector<16x128xf32>
    %5 = vector.shape_cast %3 : vector<16x128xf32> to vector<2x8x128xf32>
    %6 = vector.shape_cast %4 : vector<16x128xf32> to vector<2x8x128xf32>
    %c0_4 = arith.constant 0 : index
    %c0_5 = arith.constant 0 : index
    %c0_6 = arith.constant 0 : index
    %c0_7 = arith.constant 0 : index
    %7 = vector.load %arg4[%c0_4, %c0_5, %c0_6, %c0_7] : memref<1x5x8x128xf32, #tpu.memory_space<vmem>>, vector<1x1x8x128xf32>
    %8 = vector.shape_cast %7 : vector<1x1x8x128xf32> to vector<8x128xf32>
    %cst = arith.constant dense<0.000000e+00> : vector<8x128xf32>
    %9 = vector.multi_reduction <add>, %5, %cst [0] : vector<2x8x128xf32> to vector<8x128xf32>
    %10 = arith.addf %8, %9 : vector<8x128xf32>
    %c0_8 = arith.constant 0 : index
    %c0_9 = arith.constant 0 : index
    %c0_10 = arith.constant 0 : index
    %c0_11 = arith.constant 0 : index
    %11 = vector.load %arg4[%c0_8, %c0_9, %c0_10, %c0_11] : memref<1x5x8x128xf32, #tpu.memory_space<vmem>>, vector<1x1x8x128xf32>
    %12 = vector.shape_cast %11 : vector<1x1x8x128xf32> to vector<8x128xf32>
    %13 = vector.shape_cast %10 : vector<8x128xf32> to vector<1x1x8x128xf32>
    tpu.vector_store %arg4[%c0_8, %c0_9, %c0_10, %c0_11], %13 {strides = array<i32>} : memref<1x5x8x128xf32, #tpu.memory_space<vmem>>, vector<1x1x8x128xf32>,
    %c0_12 = arith.constant 0 : index
    %c1 = arith.constant 1 : index
    %c0_13 = arith.constant 0 : index
    %c0_14 = arith.constant 0 : index
    %14 = vector.load %arg4[%c0_12, %c1, %c0_13, %c0_14] : memref<1x5x8x128xf32, #tpu.memory_space<vmem>>, vector<1x1x8x128xf32>
    %15 = vector.shape_cast %14 : vector<1x1x8x128xf32> to vector<8x128xf32>
    %cst_15 = arith.constant dense<0.000000e+00> : vector<8x128xf32>
    %16 = vector.multi_reduction <add>, %6, %cst_15 [0] : vector<2x8x128xf32> to vector<8x128xf32>
    %17 = arith.addf %15, %16 : vector<8x128xf32>
    %c0_16 = arith.constant 0 : index
    %c1_17 = arith.constant 1 : index
    %c0_18 = arith.constant 0 : index
    %c0_19 = arith.constant 0 : index
    %18 = vector.load %arg4[%c0_16, %c1_17, %c0_18, %c0_19] : memref<1x5x8x128xf32, #tpu.memory_space<vmem>>, vector<1x1x8x128xf32>
    %19 = vector.shape_cast %18 : vector<1x1x8x128xf32> to vector<8x128xf32>
    %20 = vector.shape_cast %17 : vector<8x128xf32> to vector<1x1x8x128xf32>
    tpu.vector_store %arg4[%c0_16, %c1_17, %c0_18, %c0_19], %20 {strides = array<i32>} : memref<1x5x8x128xf32, #tpu.memory_space<vmem>>, vector<1x1x8x128xf32>,
    %c0_20 = arith.constant 0 : index
    %c2 = arith.constant 2 : index
    %c0_21 = arith.constant 0 : index
    %c0_22 = arith.constant 0 : index
    %21 = vector.load %arg4[%c0_20, %c2, %c0_21, %c0_22] : memref<1x5x8x128xf32, #tpu.memory_space<vmem>>, vector<1x1x8x128xf32>
    %22 = vector.shape_cast %21 : vector<1x1x8x128xf32> to vector<8x128xf32>
    %23 = arith.mulf %5, %5 : vector<2x8x128xf32>
    %cst_23 = arith.constant dense<0.000000e+00> : vector<8x128xf32>
    %24 = vector.multi_reduction <add>, %23, %cst_23 [0] : vector<2x8x128xf32> to vector<8x128xf32>
    %25 = arith.addf %22, %24 : vector<8x128xf32>
    %c0_24 = arith.constant 0 : index
    %c2_25 = arith.constant 2 : index
    %c0_26 = arith.constant 0 : index
    %c0_27 = arith.constant 0 : index
    %26 = vector.load %arg4[%c0_24, %c2_25, %c0_26, %c0_27] : memref<1x5x8x128xf32, #tpu.memory_space<vmem>>, vector<1x1x8x128xf32>
    %27 = vector.shape_cast %26 : vector<1x1x8x128xf32> to vector<8x128xf32>
    %28 = vector.shape_cast %25 : vector<8x128xf32> to vector<1x1x8x128xf32>
    tpu.vector_store %arg4[%c0_24, %c2_25, %c0_26, %c0_27], %28 {strides = array<i32>} : memref<1x5x8x128xf32, #tpu.memory_space<vmem>>, vector<1x1x8x128xf32>,
    %c0_28 = arith.constant 0 : index
    %c3 = arith.constant 3 : index
    %c0_29 = arith.constant 0 : index
    %c0_30 = arith.constant 0 : index
    %29 = vector.load %arg4[%c0_28, %c3, %c0_29, %c0_30] : memref<1x5x8x128xf32, #tpu.memory_space<vmem>>, vector<1x1x8x128xf32>
    %30 = vector.shape_cast %29 : vector<1x1x8x128xf32> to vector<8x128xf32>
    %31 = arith.mulf %6, %6 : vector<2x8x128xf32>
    %cst_31 = arith.constant dense<0.000000e+00> : vector<8x128xf32>
    %32 = vector.multi_reduction <add>, %31, %cst_31 [0] : vector<2x8x128xf32> to vector<8x128xf32>
    %33 = arith.addf %30, %32 : vector<8x128xf32>
    %c0_32 = arith.constant 0 : index
    %c3_33 = arith.constant 3 : index
    %c0_34 = arith.constant 0 : index
    %c0_35 = arith.constant 0 : index
    %34 = vector.load %arg4[%c0_32, %c3_33, %c0_34, %c0_35] : memref<1x5x8x128xf32, #tpu.memory_space<vmem>>, vector<1x1x8x128xf32>
    %35 = vector.shape_cast %34 : vector<1x1x8x128xf32> to vector<8x128xf32>
    %36 = vector.shape_cast %33 : vector<8x128xf32> to vector<1x1x8x128xf32>
    tpu.vector_store %arg4[%c0_32, %c3_33, %c0_34, %c0_35], %36 {strides = array<i32>} : memref<1x5x8x128xf32, #tpu.memory_space<vmem>>, vector<1x1x8x128xf32>,
    %c0_36 = arith.constant 0 : index
    %c4 = arith.constant 4 : index
    %c0_37 = arith.constant 0 : index
    %c0_38 = arith.constant 0 : index
    %37 = vector.load %arg4[%c0_36, %c4, %c0_37, %c0_38] : memref<1x5x8x128xf32, #tpu.memory_space<vmem>>, vector<1x1x8x128xf32>
    %38 = vector.shape_cast %37 : vector<1x1x8x128xf32> to vector<8x128xf32>
    %39 = arith.mulf %5, %6 : vector<2x8x128xf32>
    %cst_39 = arith.constant dense<0.000000e+00> : vector<8x128xf32>
    %40 = vector.multi_reduction <add>, %39, %cst_39 [0] : vector<2x8x128xf32> to vector<8x128xf32>
    %41 = arith.addf %38, %40 : vector<8x128xf32>
    %c0_40 = arith.constant 0 : index
    %c4_41 = arith.constant 4 : index
    %c0_42 = arith.constant 0 : index
    %c0_43 = arith.constant 0 : index
    %42 = vector.load %arg4[%c0_40, %c4_41, %c0_42, %c0_43] : memref<1x5x8x128xf32, #tpu.memory_space<vmem>>, vector<1x1x8x128xf32>
    %43 = vector.shape_cast %42 : vector<1x1x8x128xf32> to vector<8x128xf32>
    %44 = vector.shape_cast %41 : vector<8x128xf32> to vector<1x1x8x128xf32>
    tpu.vector_store %arg4[%c0_40, %c4_41, %c0_42, %c0_43], %44 {strides = array<i32>} : memref<1x5x8x128xf32, #tpu.memory_space<vmem>>, vector<1x1x8x128xf32>,
    return
  }
  func.func @transform_0(%arg0: i32, %arg1: i32) -> (i32, i32) {
    %c1_i32 = arith.constant 1 : i32
    %0 = arith.muli %arg0, %c1_i32 : i32
    %1 = arith.addi %0, %arg1 : i32
    %c0_i32 = arith.constant 0 : i32
    %2 = arith.minsi %1, %c0_i32 : i32
    %c0_i32_0 = arith.constant 0 : i32
    %c0_i32_1 = arith.constant 0 : i32
    return %2, %c0_i32_0 : i32, i32
  }
  func.func @transform_1(%arg0: i32, %arg1: i32) -> (i32, i32) {
    %c1_i32 = arith.constant 1 : i32
    %0 = arith.muli %arg0, %c1_i32 : i32
    %1 = arith.addi %0, %arg1 : i32
    %c0_i32 = arith.constant 0 : i32
    %2 = arith.minsi %1, %c0_i32 : i32
    %c0_i32_0 = arith.constant 0 : i32
    %c0_i32_1 = arith.constant 0 : i32
    return %2, %c0_i32_0 : i32, i32
  }
  func.func @transform_2(%arg0: i32, %arg1: i32) -> (i32, i32, i32, i32) {
    %c0_i32 = arith.constant 0 : i32
    %c0_i32_0 = arith.constant 0 : i32
    %c0_i32_1 = arith.constant 0 : i32
    %c0_i32_2 = arith.constant 0 : i32
    return %arg0, %c0_i32, %c0_i32_0, %c0_i32_1 : i32, i32, i32, i32
  }
}

</mosaic_0001>

<bundles_post_ra>
// kernel: pearson_correlation_loss.1
= control target key start
LH: loop header
LB: loop body
LE: loop exit
PB: predicated region body
PF: predicated region fallthrough
CT: control target
= control target key end

     0   :  { %s185_s0 = inlined_call_operand.vmem [shape: f32[16,128], index: 0, kind: input, shape index: {}]   ;;  %s186_s1 = inlined_call_operand.vmem [shape: f32[16,128], index: 1, kind: input, shape index: {}]   ;;  %s187_s2 = inlined_call_operand.vmem [shape: f32[1,5,8,128], index: 2, kind: output, shape index: {}]  }
   0x1   :  { %v84_v0 = vld [vmem:[%s185_s0] sm:$0xff]  ;;  %v85_v1 = vld [vmem:[%s185_s0 + $0x8] sm:$0xff] }
   0x2   :  { %v86_v2 = vld [vmem:[%s186_s1] sm:$0xff]  ;;  %v89_v3 = vadd.f32 %v85_v1, %v84_v0  ;;  %v87_v4 = vld [vmem:[%s186_s1 + $0x8] sm:$0xff]  ;;  %v99_v5 = vmul.f32 %v84_v0, %v84_v0  ;;  %v100_v6 = vmul.f32 %v85_v1, %v85_v1 }
   0x3   :  { %v106_v7 = vmul.f32 %v86_v2, %v86_v2  ;;  %v94_v8 = vadd.f32 %v87_v4, %v86_v2  ;;  %v107_v9 = vmul.f32 %v87_v4, %v87_v4  ;;  %v113_v10 = vmul.f32 %v86_v2, %v84_v0 }
   0x4   :  { %v114_v11 = vmul.f32 %v87_v4, %v85_v1  ;;  %v101_v12 = vadd.f32 %v100_v6, %v99_v5  ;;  %91 = vst [vmem:[%s187_s2] sm:$0xff] %v89_v3 }
   0x5   :  { %v108_v13 = vadd.f32 %v107_v9, %v106_v7  ;;  %135 = vst [vmem:[%s187_s2 + $0x8] sm:$0xff] %v94_v8 }
   0x6   :  { %v115_v14 = vadd.f32 %v114_v11, %v113_v10  ;;  %137 = vst [vmem:[%s187_s2 + $0x10] sm:$0xff] %v101_v12 }
   0x7   :  { %139 = vst [vmem:[%s187_s2 + $0x18] sm:$0xff] %v108_v13 }
   0x8   :  { %141 = vst [vmem:[%s187_s2 + $0x20] sm:$0xff] %v115_v14 }

</bundles_post_ra>
